<compile_context>
chip_gen: v7x
topology: tpu7x:2x2x1
jax: 0.10.0
libtpu: 0.0.40
codegen_flags: <defaults>
</compile_context>

<pallas_src>
import jax
import jax.numpy as jnp
from jax.experimental import pallas as pl
from jax.experimental.pallas import tpu as pltpu

OBS_DIM = 3
K_PAD = 8        # fc1 input features padded to 8 (32-byte DMA rows, clean MXU operand)
HIDDEN = 128
N_ACTIONS = 2
OUT_PAD = 8      # fc3 output columns padded to 8 (was 128)


def _round_up(n, m):
    return ((n + m - 1) // m) * m


def qnet_kernel(x_ref, w1_ref, w2_ref, w3_ref, b12_ref, b3_ref, o_ref):
    # x_ref  : (tb, 8)     f32  batch tile of observations (cols 3..7 zero)
    # w1_ref : (8, 128)    bf16 fc1 weight, input-dim padded (rows 3..7 zero)
    # w2_ref : (128, 128)  bf16 fc2 weight
    # w3_ref : (128, 8)    bf16 fc3 weight, output-dim padded (cols 2..7 zero)
    # b12_ref: (2, 128)    f32  row 0 = b1, row 1 = b2
    # b3_ref : (1, 2)      f32  fc3 bias
    # o_ref  : (tb, 2)     f32  Q-values (only the real columns are written)
    x = x_ref[...].astype(jnp.bfloat16)

    # fc1 on the MXU (K padded to 8), f32 accumulate, bias + ReLU on the VPU.
    h1 = jnp.dot(x, w1_ref[...], preferred_element_type=jnp.float32)
    h1 = jnp.maximum(h1 + b12_ref[0:1, :], 0.0)                      # (tb, 128) f32

    # fc2 on the MXU.
    h2 = jnp.dot(h1.astype(jnp.bfloat16), w2_ref[...],
                 preferred_element_type=jnp.float32)
    h2 = jnp.maximum(h2 + b12_ref[1:2, :], 0.0)                      # (tb, 128) f32

    # fc3 on the MXU (8 padded output columns); keep only the 2 real ones.
    q = jnp.dot(h2.astype(jnp.bfloat16), w3_ref[...],
                preferred_element_type=jnp.float32)                  # (tb, 8) f32
    o_ref[...] = (q[:, :N_ACTIONS] + b3_ref[...]).astype(o_ref.dtype)


def init_qnet_params(key):
    """Deterministic init mimicking nn.Linear's default U(-1/sqrt(fan_in), ...).

    Weights stored as (in, out), i.e. the transpose of PyTorch's (out, in).
    """
    dims = [(OBS_DIM, HIDDEN), (HIDDEN, HIDDEN), (HIDDEN, N_ACTIONS)]
    params = []
    for fan_in, fan_out in dims:
        kw, kb, key = jax.random.split(key, 3)
        bound = 1.0 / (fan_in ** 0.5)
        w = jax.random.uniform(kw, (fan_in, fan_out), jnp.float32, -bound, bound)
        b = jax.random.uniform(kb, (1, fan_out), jnp.float32, -bound, bound)
        params.extend([w, b])
    return params


def pack_params(w1, b1, w2, b2, w3, b3):
    """Pack params into the kernel's resident buffers (weights bf16, biases f32)."""
    w1p = jnp.zeros((K_PAD, HIDDEN), jnp.bfloat16).at[:OBS_DIM, :].set(
        w1.astype(jnp.bfloat16))
    w2b = w2.astype(jnp.bfloat16)
    w3p = jnp.zeros((HIDDEN, OUT_PAD), jnp.bfloat16).at[:, :N_ACTIONS].set(
        w3.astype(jnp.bfloat16))
    b12 = jnp.stack([b1.reshape(-1), b2.reshape(-1)], axis=0).astype(jnp.float32)
    b3p = b3.reshape(1, N_ACTIONS).astype(jnp.float32)
    return w1p, w2b, w3p, b12, b3p


def _choose_tiling(B, max_tile=2048):
    """Pick a tile row count (multiple of 8) and padded batch so tiles divide exactly.

    Guarantees >=2 (even) tiles when B > 8 so v7x megacore gets both TensorCores.
    """
    b8 = _round_up(B, 8)
    if b8 <= 8:
        return 8, 8
    n_tiles = max(2, -(-b8 // max_tile))
    if n_tiles % 2:
        n_tiles += 1            # even tile count => balanced across the 2 TCs
    tb = _round_up(-(-b8 // n_tiles), 8)
    return tb, tb * n_tiles


def qnet_forward(x, w1p, w2b, w3p, b12, b3p, *, max_tile=2048):
    """x: (B, 3) f32 observations. Returns (B, 2) f32 Q-values."""
    B = x.shape[0]
    tb, b_pad = _choose_tiling(B, max_tile)
    # Pad batch to the tiled extent and input features 3 -> 8 (zeros are inert for fc1).
    xp = jnp.pad(x, ((0, b_pad - B), (0, K_PAD - OBS_DIM)))

    out = pl.pallas_call(
        qnet_kernel,
        out_shape=jax.ShapeDtypeStruct((b_pad, N_ACTIONS), jnp.float32),
        grid_spec=pltpu.PrefetchScalarGridSpec(
            num_scalar_prefetch=0,
            grid=(b_pad // tb,),
            in_specs=[
                pl.BlockSpec((tb, K_PAD), lambda i: (i, 0)),           # x: tiled over batch
                # Constant index_maps -> DMA'd once, resident across the whole grid.
                pl.BlockSpec((K_PAD, HIDDEN), lambda i: (0, 0)),       # w1 (bf16, padded)
                pl.BlockSpec((HIDDEN, HIDDEN), lambda i: (0, 0)),      # w2 (bf16)
                pl.BlockSpec((HIDDEN, OUT_PAD), lambda i: (0, 0)),     # w3 (bf16, padded)
                pl.BlockSpec((2, HIDDEN), lambda i: (0, 0)),           # b1, b2 (f32)
                pl.BlockSpec((1, N_ACTIONS), lambda i: (0, 0)),        # b3 (f32)
            ],
            out_specs=pl.BlockSpec((tb, N_ACTIONS), lambda i: (i, 0)),  # narrow output
        ),
        compiler_params=pltpu.CompilerParams(
            dimension_semantics=("parallel",)),    # megacore sharding on v7x
    )(xp, w1p, w2b, w3p, b12, b3p)
    return out if b_pad == B else out[:B]


if __name__ == "__main__":
    key = jax.random.PRNGKey(0)
    kx, kp = jax.random.split(key)

    w1, b1, w2, b2, w3, b3 = init_qnet_params(kp)
    packed = pack_params(w1, b1, w2, b2, w3, b3)

    # TODO(synk): Qnet.sample_action's host-side epsilon-greedy (random.random /
    # argmax().item()) is Python control flow around the forward pass; not in-kernel.

    for B in (5, 8, 640):   # non-multiple-of-8, single-tile, and multi-tile cases
        kx, sub = jax.random.split(kx)
        x = jax.random.normal(sub, (B, OBS_DIM), dtype=jnp.float32)

        out = jax.block_until_ready(qnet_forward(x, *packed))

        # Pure f32 reference of the same math (bf16 MXU path loosens tolerance).
        hp = jax.lax.Precision.HIGHEST
        ref = jnp.maximum(jnp.dot(x, w1, precision=hp) + b1, 0.0)
        ref = jnp.maximum(jnp.dot(ref, w2, precision=hp) + b2, 0.0)
        ref = jnp.dot(ref, w3, precision=hp) + b3

        assert out.shape == (B, N_ACTIONS)
        err = float(jnp.max(jnp.abs(out - ref)))
        assert jnp.allclose(out, ref, atol=2e-2, rtol=2e-2), ("max abs err:", err)

    print("KERNEL_OK")
</pallas_src>

<mosaic_0001>
module attributes {stable_mosaic.version = 11 : i64} {
  func.func @qnet_kernel(%arg0: i32, %arg1: memref<8x8xf32, #tpu.memory_space<vmem>>, %arg2: memref<8x128xbf16, #tpu.memory_space<vmem>>, %arg3: memref<128x128xbf16, #tpu.memory_space<vmem>>, %arg4: memref<128x8xbf16, #tpu.memory_space<vmem>>, %arg5: memref<2x128xf32, #tpu.memory_space<vmem>>, %arg6: memref<1x2xf32, #tpu.memory_space<vmem>>, %arg7: memref<8x2xf32, #tpu.memory_space<vmem>>) attributes {dimension_semantics = [#tpu.dimension_semantics<parallel>], iteration_bounds = array<i64: 1>, scalar_prefetch = 0 : i64, scratch_operands = 0 : i64, tpu.core_type = #tpu.core_type<tc>, window_params = [{transform_indices = @transform_0, window_bounds = array<i64: 8, 8>}, {pipeline_mode = #tpu.pipeline_mode<synchronous>, transform_indices = @transform_1, window_bounds = array<i64: 8, 128>}, {pipeline_mode = #tpu.pipeline_mode<synchronous>, transform_indices = @transform_2, window_bounds = array<i64: 128, 128>}, {pipeline_mode = #tpu.pipeline_mode<synchronous>, transform_indices = @transform_3, window_bounds = array<i64: 128, 8>}, {pipeline_mode = #tpu.pipeline_mode<synchronous>, transform_indices = @transform_4, window_bounds = array<i64: 2, 128>}, {pipeline_mode = #tpu.pipeline_mode<synchronous>, transform_indices = @transform_5, window_bounds = array<i64: 1, 2>}, {transform_indices = @transform_6, window_bounds = array<i64: 8, 2>}]} {
    %c0 = arith.constant 0 : index
    %c0_0 = arith.constant 0 : index
    %0 = vector.load %arg1[%c0, %c0_0] : memref<8x8xf32, #tpu.memory_space<vmem>>, vector<8x8xf32>
    %1 = arith.truncf %0 : vector<8x8xf32> to vector<8x8xbf16>
    %c0_1 = arith.constant 0 : index
    %c0_2 = arith.constant 0 : index
    %2 = vector.load %arg2[%c0_1, %c0_2] : memref<8x128xbf16, #tpu.memory_space<vmem>>, vector<8x128xbf16>
    %cst = arith.constant dense<0.000000e+00> : vector<8x128xf32>
    %3 = tpu.matmul %1, %2, %cst {dimension_numbers = #tpu.dot_dimension_numbers<[1], [0], [0], [1], [0, 0, 1, 1], [], []>} : vector<8x8xbf16>, vector<8x128xbf16>, vector<8x128xf32> -> vector<8x128xf32>
    %c0_3 = arith.constant 0 : index
    %c0_4 = arith.constant 0 : index
    %4 = vector.load %arg5[%c0_3, %c0_4] : memref<2x128xf32, #tpu.memory_space<vmem>>, vector<1x128xf32>
    %5 = vector.broadcast %4 : vector<1x128xf32> to vector<8x128xf32>
    %6 = arith.addf %3, %5 : vector<8x128xf32>
    %cst_5 = arith.constant 0.000000e+00 : f32
    %7 = vector.broadcast %cst_5 : f32 to vector<8x128xf32>
    %8 = arith.maximumf %6, %7 : vector<8x128xf32>
    %9 = arith.truncf %8 : vector<8x128xf32> to vector<8x128xbf16>
    %c0_6 = arith.constant 0 : index
    %c0_7 = arith.constant 0 : index
    %10 = vector.load %arg3[%c0_6, %c0_7] : memref<128x128xbf16, #tpu.memory_space<vmem>>, vector<128x128xbf16>
    %cst_8 = arith.constant dense<0.000000e+00> : vector<8x128xf32>
    %11 = tpu.matmul %9, %10, %cst_8 {dimension_numbers = #tpu.dot_dimension_numbers<[1], [0], [0], [1], [0, 0, 1, 1], [], []>} : vector<8x128xbf16>, vector<128x128xbf16>, vector<8x128xf32> -> vector<8x128xf32>
    %c1 = arith.constant 1 : index
    %c0_9 = arith.constant 0 : index
    %12 = vector.load %arg5[%c1, %c0_9] : memref<2x128xf32, #tpu.memory_space<vmem>>, vector<1x128xf32>
    %13 = vector.broadcast %12 : vector<1x128xf32> to vector<8x128xf32>
    %14 = arith.addf %11, %13 : vector<8x128xf32>
    %cst_10 = arith.constant 0.000000e+00 : f32
    %15 = vector.broadcast %cst_10 : f32 to vector<8x128xf32>
    %16 = arith.maximumf %14, %15 : vector<8x128xf32>
    %17 = arith.truncf %16 : vector<8x128xf32> to vector<8x128xbf16>
    %c0_11 = arith.constant 0 : index
    %c0_12 = arith.constant 0 : index
    %18 = vector.load %arg4[%c0_11, %c0_12] : memref<128x8xbf16, #tpu.memory_space<vmem>>, vector<128x8xbf16>
    %cst_13 = arith.constant dense<0.000000e+00> : vector<8x8xf32>
    %19 = tpu.matmul %17, %18, %cst_13 {dimension_numbers = #tpu.dot_dimension_numbers<[1], [0], [0], [1], [0, 0, 1, 1], [], []>} : vector<8x128xbf16>, vector<128x8xbf16>, vector<8x8xf32> -> vector<8x8xf32>
    %20 = vector.extract_strided_slice %19 {offsets = [0, 0], sizes = [8, 2], strides = [1, 1]} : vector<8x8xf32> to vector<8x2xf32>
    %c0_14 = arith.constant 0 : index
    %c0_15 = arith.constant 0 : index
    %21 = vector.load %arg6[%c0_14, %c0_15] : memref<1x2xf32, #tpu.memory_space<vmem>>, vector<1x2xf32>
    %22 = vector.broadcast %21 : vector<1x2xf32> to vector<8x2xf32>
    %23 = arith.addf %20, %22 : vector<8x2xf32>
    %c0_16 = arith.constant 0 : index
    %c0_17 = arith.constant 0 : index
    %24 = vector.load %arg7[%c0_16, %c0_17] : memref<8x2xf32, #tpu.memory_space<vmem>>, vector<8x2xf32>
    tpu.vector_store %arg7[%c0_16, %c0_17], %23 {strides = array<i32>} : memref<8x2xf32, #tpu.memory_space<vmem>>, vector<8x2xf32>,
    return
  }
  func.func @transform_0(%arg0: i32) -> (i32, i32) {
    %c0_i32 = arith.constant 0 : i32
    %c0_i32_0 = arith.constant 0 : i32
    return %arg0, %c0_i32 : i32, i32
  }
  func.func @transform_1(%arg0: i32) -> (i32, i32) {
    %c0_i32 = arith.constant 0 : i32
    %c0_i32_0 = arith.constant 0 : i32
    %c0_i32_1 = arith.constant 0 : i32
    return %c0_i32, %c0_i32_0 : i32, i32
  }
  func.func @transform_2(%arg0: i32) -> (i32, i32) {
    %c0_i32 = arith.constant 0 : i32
    %c0_i32_0 = arith.constant 0 : i32
    %c0_i32_1 = arith.constant 0 : i32
    return %c0_i32, %c0_i32_0 : i32, i32
  }
  func.func @transform_3(%arg0: i32) -> (i32, i32) {
    %c0_i32 = arith.constant 0 : i32
    %c0_i32_0 = arith.constant 0 : i32
    %c0_i32_1 = arith.constant 0 : i32
    return %c0_i32, %c0_i32_0 : i32, i32
  }
  func.func @transform_4(%arg0: i32) -> (i32, i32) {
    %c0_i32 = arith.constant 0 : i32
    %c0_i32_0 = arith.constant 0 : i32
    %c0_i32_1 = arith.constant 0 : i32
    return %c0_i32, %c0_i32_0 : i32, i32
  }
  func.func @transform_5(%arg0: i32) -> (i32, i32) {
    %c0_i32 = arith.constant 0 : i32
    %c0_i32_0 = arith.constant 0 : i32
    %c0_i32_1 = arith.constant 0 : i32
    return %c0_i32, %c0_i32_0 : i32, i32
  }
  func.func @transform_6(%arg0: i32) -> (i32, i32) {
    %c0_i32 = arith.constant 0 : i32
    %c0_i32_0 = arith.constant 0 : i32
    return %arg0, %c0_i32 : i32, i32
  }
}

</mosaic_0001>

<bundles_post_ra>
// kernel: tpu_custom_call.1
= control target key start
LH: loop header
LB: loop body
LE: loop exit
PB: predicated region body
PF: predicated region fallthrough
CT: control target
= control target key end

     0   :  { %11 = vsyncpa [#allocation3], 0  ;;  %s453_s21 = smov [#allocation2]   ;;  %s589_s0 = inlined_call_operand.vmem [shape: f32[8,8], index: 0, kind: input, shape index: {}]   ;;  %s590_s1 = inlined_call_operand.hbm [shape: bf16[8,128], index: 1, kind: input, shape index: {}]   ;;  %s591_s2 = inlined_call_operand.vmem [shape: bf16[128,128], index: 2, kind: input, shape index: {}]   ;;  %s592_s3 = inlined_call_operand.vmem [shape: bf16[128,8], index: 3, kind: input, shape index: {}]   ;;  %s593_s4 = inlined_call_operand.vmem [shape: f32[2,128], index: 4, kind: input, shape index: {}]   ;;  %s594_s5 = inlined_call_operand.vmem [shape: f32[1,2], index: 5, kind: input, shape index: {}]   ;;  %s595_s6 = inlined_call_operand.vmem [shape: f32[8,2], index: 6, kind: output, shape index: {}]  }
   0x1   :  { %s20_s22 = sshll.u32 %s453_s21, 4  ;;  %s429_s25 = scalar_lea.hbm %s590_s1, 64  ;;  %s21_s22 = int_to_ptr.vmem [resolvable:$true] %s20_s22 }
   0x2   :  { %p430_p0 = scmp.ne.s32.totalorder %s590_s1, %s429_s25  ;;  %p433_p1 = scmp.lt.u32.totalorder %s429_s25, %s590_s1 }
   0x4   :  { %p435_p2 = pnand %p433_p1, %p430_p0 }
   0x6   :  { %438 = shalt.err (!%p435_p2)
}
   0x7   :  { %s439_s30 = scalar_lea.vmem %s21_s22, 64  ;;  %p444_p4 = scmp.lt.s32.totalorder %s21_s22, %s21_s22 }
   0x8   :  { %p440_p3 = scmp.ne.s32.totalorder %s21_s22, %s439_s30  ;;  %p445_p5 = scmp.lt.s32.totalorder %s439_s30, %s439_s30 }
   0xa   :  { %p446_p6 = por %p445_p5, %p444_p4 }
   0xc   :  { %p447_p7 = pnand %p446_p6, %p440_p3 }
   0xe   :  { %450 = shalt.err (!%p447_p7)
}
   0xf   :  { %23 = dma.hbm_to_vmem [thread:$0]  %s590_s1, 64, %s21_s22, [#allocation3]  }
  0x10   :  { %451 = dma.done.wait [#allocation3], 64  }
  0x11   :  { %452 = vsyncadd [#allocation3], 4294967232  ;;  %v454_v0 = vmov 0.0   ;;  %vm455_vm0 = vmmov 0   ;;  %vm48_vm1 = vcmask 1043456   ;;  %v36_v2 = vld [vmem:[%s589_s0] sm:$0xff] }
  0x12   :  { %364 = vmatprep.subr.bf16.mxu0 %v454_v0  ;;  %366 = vmatprep.mubr.msk.bf16.mxu0 %vm455_vm0, %v454_v0  ;;  %v38_v1 = vld [vmem:[#allocation2] sm:$0xf]  ;;  %v37_v4 = vpack.c.bf16 %v36_v2, %v36_v2  ;;  %vm44_vm2 = vcmask 64512   ;;  %v414_v6 = vld [vmem:[%s591_s2 + $0x8] sm:$0xff]   ;;  %v415_v7 = vld [vmem:[%s591_s2 + $0x10] sm:$0xff]   ;;  %vm317_vm3 = vcmask 15360  }
  0x13   :  { %370 = vmatprep.subr.bf16.mxu1 %v454_v0  ;;  %386 = vmatprep.mubr.msk.bf16.mxu1 %vm455_vm0, %v454_v0  ;;  %v50_v3 = vsel %vm48_vm1, %v38_v1, 0  ;;  %v413_v5 = vld [vmem:[%s591_s2] sm:$0xff]   ;;  %v416_v8 = vld [vmem:[%s591_s2 + $0x18] sm:$0xff]   ;;  %v418_v10 = vld [vmem:[%s591_s2 + $0x28] sm:$0xff]  }
  0x14   :  { %365 = vmatpush3.bf16.msra.mxu0 %v50_v3  ;;  %371 = vmatpush3.bf16.msra.mxu1 %v413_v5  ;;  %v417_v9 = vld [vmem:[%s591_s2 + $0x20] sm:$0xff]   ;;  %v419_v11 = vld [vmem:[%s591_s2 + $0x30] sm:$0xff]   ;;  %v420_v12 = vld [vmem:[%s591_s2 + $0x38] sm:$0xff]  }
  0x15   :  { %390 = vmatprep.subr.bf16.mxu0 %v454_v0  ;;  %372 = vmatprep.subr.bf16.mxu1 %v454_v0  ;;  %v421_v13 = vld [vmem:[%s592_s3] sm:$0xff]   ;;  %v422_v14 = vld [vmem:[%s592_s3 + $0x8] sm:$0xff]   ;;  %v423_v15 = vld [vmem:[%s592_s3 + $0x10] sm:$0xff]  }
  0x16   :  { %v424_v16 = vld [vmem:[%s592_s3 + $0x18] sm:$0xff]   ;;  %v425_v17 = vld [vmem:[%s592_s3 + $0x20] sm:$0xff]   ;;  %v426_v18 = vld [vmem:[%s592_s3 + $0x28] sm:$0xff]  }
  0x17   :  { %367 = vmatmul.mubr.msk.bf16.vlgmr.msra.gmra.mrb[0].mxu0 %vm44_vm2, %v37_v4  ;;  %v324_v19 = vld [vmem:[%s593_s4] ss:$0 sm:$0xff]  ;;  %v427_v27 = vld [vmem:[%s592_s3 + $0x30] sm:$0xff]   ;;  %v428_v28 = vld [vmem:[%s592_s3 + $0x38] sm:$0xff]  }
  0x18   :  { %406 = vmatprep.mubr.msk.bf16.mxu0 %vm455_vm0, %v454_v0  ;;  %373 = vmatpush3.bf16.msra.mxu1 %v414_v6  ;;  %v326_v29 = vld [vmem:[%s593_s4 + $0x1] ss:$0 sm:$0xff]  ;;  %v343_v37 = vld [vmem:[%s594_s5] ss:$0 sm:$0xff] }
  0x19   :  { %374 = vmatprep.subr.bf16.mxu1 %v454_v0  ;;  %391 = vmatpush3.bf16.msra.mxu0 %v421_v13 }
  0x1a   :  { %392 = vmatprep.subr.bf16.mxu0 %v454_v0 }
  0x1c   :  { %375 = vmatpush3.bf16.msra.mxu1 %v415_v7 }
  0x1d   :  { %376 = vmatprep.subr.bf16.mxu1 %v454_v0  ;;  %393 = vmatpush3.bf16.msra.mxu0 %v422_v14 }
  0x1e   :  { %394 = vmatprep.subr.bf16.mxu0 %v454_v0 }
  0x20   :  { %377 = vmatpush3.bf16.msra.mxu1 %v416_v8 }
  0x21   :  { %378 = vmatprep.subr.bf16.mxu1 %v454_v0  ;;  %395 = vmatpush3.bf16.msra.mxu0 %v423_v15 }
  0x22   :  { %396 = vmatprep.subr.bf16.mxu0 %v454_v0 }
  0x24   :  { %379 = vmatpush3.bf16.msra.mxu1 %v417_v9 }
  0x25   :  { %380 = vmatprep.subr.bf16.mxu1 %v454_v0  ;;  %397 = vmatpush3.bf16.msra.mxu0 %v424_v16 }
  0x26   :  { %398 = vmatprep.subr.bf16.mxu0 %v454_v0 }
  0x28   :  { %381 = vmatpush3.bf16.msra.mxu1 %v418_v10 }
  0x29   :  { %382 = vmatprep.subr.bf16.mxu1 %v454_v0  ;;  %399 = vmatpush3.bf16.msra.mxu0 %v425_v17 }
  0x2a   :  { %400 = vmatprep.subr.bf16.mxu0 %v454_v0 }
  0x2c   :  { %383 = vmatpush3.bf16.msra.mxu1 %v419_v11 }
  0x2d   :  { %384 = vmatprep.subr.bf16.mxu1 %v454_v0  ;;  %401 = vmatpush3.bf16.msra.mxu0 %v426_v18 }
  0x2e   :  { %402 = vmatprep.subr.bf16.mxu0 %v454_v0 }
  0x30   :  { %385 = vmatpush3.bf16.msra.mxu1 %v420_v12 }
  0x31   :  { %403 = vmatpush3.bf16.msra.mxu0 %v427_v27 }
  0x32   :  { %404 = vmatprep.subr.bf16.mxu0 %v454_v0 }
  0x35   :  { %405 = vmatpush3.bf16.msra.mxu0 %v428_v28 }
  0xea   :  { %v86_v20 = vpop.f32.mrb[0].mxu0 }
  0xeb   :  { %v87_v21 = vadd.f32 %v324_v19, %v86_v20  ;;  %v368_v22 = vpop.f32.mrb[1].mxu0 }
  0xec   :  { %v89_v23 = vpop.f32.mrb[2].mxu0 }
  0xed   :  { %v92_v24 = vmax.f32 %v87_v21, 0.0  ;;  %v369_v25 = vpop.f32.mrb[3].mxu0 }
  0xef   :  { %v93_v26 = vpack.c.bf16 %v92_v24, %v92_v24 }
  0xf1   :  { %387 = vmatmul.mubr.bf16.vlgmr.msra.gmra.mrb[0].mxu1 %v93_v26 }
 0x1c4   :  { %v197_v30 = vpop.f32.mrb[0].mxu1 }
 0x1c5   :  { %v198_v31 = vadd.f32 %v326_v29, %v197_v30  ;;  %v388_v32 = vpop.f32.mrb[1].mxu1 }
 0x1c6   :  { %v200_v33 = vpop.f32.mrb[2].mxu1 }
 0x1c7   :  { %v203_v34 = vmax.f32 %v198_v31, 0.0  ;;  %v389_v35 = vpop.f32.mrb[3].mxu1 }
 0x1c9   :  { %v204_v36 = vpack.c.bf16 %v203_v34, %v203_v34 }
 0x1cb   :  { %407 = vmatmul.mubr.bf16.vlgmr.msra.gmra.mrb[4].mxu0 %v204_v36 }
 0x29e   :  { %v303_v38 = vpop.f32.mrb[4].mxu0 }
 0x29f   :  { %v316_v39 = vadd.f32 %v343_v37, %v303_v38  ;;  %v408_v40 = vpop.f32.mrb[5].mxu0 }
 0x2a0   :  { %v306_v41 = vpop.f32.mrb[6].mxu0 }
 0x2a1   :  { %318 = vst.msk [vmem:[%s595_s6] sm:$0xff] %vm317_vm3, %v316_v39  ;;  %v409_v42 = vpop.f32.mrb[7].mxu0 }
 0x2a2   :  { %323 = vsyncpa [#allocation3], 1 }

</bundles_post_ra>
